<compile_context>
chip_gen: v6e
topology: v6e:2x2x1
jax: 0.10.0
libtpu: 0.0.40
codegen_flags: <defaults>
</compile_context>

<pallas_src>
import jax
import jax.numpy as jnp
from jax.experimental import pallas as pl
from jax.experimental.pallas import tpu as pltpu


def _round_up(v, m):
    return ((v + m - 1) // m) * m


def _pool_select(in_size, out_size, kernel_size, stride):
    """0/1 selection matrix (in_size, out_size): column q marks its window."""
    i = jnp.arange(in_size)[:, None]
    o = jnp.arange(out_size)[None, :]
    return ((i >= o * stride) & (i < o * stride + kernel_size)).astype(jnp.float32)


def _choose_fold(bc, in_pix, out_pix):
    """Smallest row-fold that makes the output row width a multiple of 128."""
    if out_pix % 128 == 0:
        return 1
    for f in (2, 4, 8, 16):
        if (
            bc % f == 0
            and (f * out_pix) % 128 == 0
            and (f * in_pix) * (f * out_pix) * 4 <= (2 << 20)  # keep K small
        ):
            return f
    return 1


def _choose_tile(rows, in_row_bytes, row_bytes, mult):
    # ~8 MiB input block per grid step so the ~0.35 us per-step cost is <10%
    # of the DMA time even on v7x's 3.2 TB/s HBM; cap keeps double-buffered
    # steady state well under the 48 MiB VMEM limit on every generation.
    tile = max(mult, (8 << 20) // max(in_row_bytes, 1))
    tile = min(tile, 4096)
    if tile >= rows:
        return rows
    # Prefer >= 4 grid steps (>= 2 per v7x TensorCore) when each step still
    # moves >= ~4 MiB of HBM traffic; otherwise keep the big block.
    quarter = _round_up(pl.cdiv(rows, 4), mult)
    if quarter < tile and quarter * row_bytes >= (4 << 20):
        tile = quarter
    tile = max(mult, (tile // mult) * mult)
    return min(tile, rows)


def _make_kernel(op_dtype, inv_kk):
    def kernel(x_ref, k_ref, o_ref):
        # x_ref: (tile, fold*H*W) in the input dtype
        # k_ref: (fold*H*W, fold*H_out*W_out) 0/1 selection matrix (op_dtype)
        # o_ref: (tile, fold*H_out*W_out)
        x = x_ref[...]
        x2 = (x * x).astype(op_dtype)
        # Default Mosaic precision: f32 operands use the accurate f32 MXU
        # path; bf16 operands stay single-pass (keeps v5e/v7x HBM-bound).
        acc = jnp.dot(x2, k_ref[...], preferred_element_type=jnp.float32)
        o_ref[...] = jnp.sqrt(acc * inv_kk + 1e-6).astype(o_ref.dtype)

    return kernel


def l2_pool2d(x, kernel_size, stride=None):
    """Pallas implementation of L2Pool2d.forward for NCHW inputs."""
    stride = stride or kernel_size
    N, C, H, W = x.shape
    H_out = (H - kernel_size) // stride + 1
    W_out = (W - kernel_size) // stride + 1
    in_pix, out_pix = H * W, H_out * W_out
    BC = N * C

    op_dtype = jnp.bfloat16 if x.dtype == jnp.bfloat16 else jnp.float32

    # Fold NC rows so the output slab is a dense multiple of 128 lanes.
    fold = _choose_fold(BC, in_pix, out_pix)
    rows = BC // fold

    # 0/1 Kronecker pooling matrix (exact in bf16); 1/(k*k) applied in f32
    # epilogue inside the kernel.
    sh = _pool_select(H, H_out, kernel_size, stride)          # (H, H_out)
    sw = _pool_select(W, W_out, kernel_size, stride)          # (W, W_out)
    kmat = jnp.einsum("hp,wq->hwpq", sh, sw).reshape(in_pix, out_pix)
    if fold > 1:
        kmat = jnp.kron(jnp.eye(fold, dtype=jnp.float32), kmat)
    kmat = kmat.astype(op_dtype)
    # TODO(synk): K scales as (fold*H*W)*(fold*H_out*W_out); for very large
    # spatial maps switch to a channels-last VPU shifted-add pooling kernel.

    # Free contiguous views; no HBM copies (no pad, no output slice).
    x2d = x.reshape(rows, fold * in_pix)

    itemsize = jnp.dtype(x.dtype).itemsize
    mult = max(8, 32 // itemsize)                             # sublane pack
    in_row_bytes = fold * in_pix * itemsize
    row_bytes = fold * (in_pix + out_pix) * itemsize
    tile = _choose_tile(rows, in_row_bytes, row_bytes, mult)
    grid = (pl.cdiv(rows, tile),)

    kernel = _make_kernel(op_dtype, 1.0 / float(kernel_size * kernel_size))

    out2d = pl.pallas_call(
        kernel,
        out_shape=jax.ShapeDtypeStruct((rows, fold * out_pix), x.dtype),
        grid_spec=pltpu.PrefetchScalarGridSpec(
            num_scalar_prefetch=0,
            grid=grid,
            in_specs=[
                pl.BlockSpec((tile, fold * in_pix), lambda i: (i, 0)),
                pl.BlockSpec(kmat.shape, lambda i: (0, 0)),
            ],
            out_specs=pl.BlockSpec((tile, fold * out_pix), lambda i: (i, 0)),
        ),
        compiler_params=pltpu.CompilerParams(
            dimension_semantics=("parallel",),
            vmem_limit_bytes=48 * 1024 * 1024,
        ),
    )(x2d, kmat)

    return out2d.reshape(N, C, H_out, W_out)


def _reference_l2_pool2d(x, kernel_size, stride=None):
    """Pure-JAX reference (F.avg_pool2d(x**2, k, s) then sqrt(+1e-6))."""
    stride = stride or kernel_size
    x2 = x.astype(jnp.float32) ** 2
    summed = jax.lax.reduce_window(
        x2,
        0.0,
        jax.lax.add,
        window_dimensions=(1, 1, kernel_size, kernel_size),
        window_strides=(1, 1, stride, stride),
        padding="VALID",
    )
    avg = summed / float(kernel_size * kernel_size)
    return jnp.sqrt(avg + 1e-6).astype(x.dtype)


if __name__ == "__main__":
    key = jax.random.PRNGKey(0)
    # Small NCHW input consistent with the module's forward.
    x = jax.random.normal(key, (2, 4, 16, 16), dtype=jnp.float32)

    kernel_size = 2
    stride = 2  # default stride = kernel_size, as in the module

    out = jax.block_until_ready(l2_pool2d(x, kernel_size, stride))
    ref = _reference_l2_pool2d(x, kernel_size, stride)

    assert out.shape == (2, 4, 8, 8), out.shape
    assert jnp.allclose(out, ref, atol=1e-5, rtol=1e-5), "mismatch vs reference"

    print("KERNEL_OK")
</pallas_src>

<mosaic_0001>
module attributes {stable_mosaic.version = 11 : i64} {
  func.func @kernel(%arg0: i32, %arg1: memref<4x512xf32, #tpu.memory_space<vmem>>, %arg2: memref<512x128xf32, #tpu.memory_space<vmem>>, %arg3: memref<4x128xf32, #tpu.memory_space<vmem>>) attributes {dimension_semantics = [#tpu.dimension_semantics<parallel>], iteration_bounds = array<i64: 1>, scalar_prefetch = 0 : i64, scratch_operands = 0 : i64, tpu.core_type = #tpu.core_type<tc>, window_params = [{transform_indices = @transform_0, window_bounds = array<i64: 4, 512>}, {pipeline_mode = #tpu.pipeline_mode<synchronous>, transform_indices = @transform_1, window_bounds = array<i64: 512, 128>}, {transform_indices = @transform_2, window_bounds = array<i64: 4, 128>}]} {
    %c0 = arith.constant 0 : index
    %c0_0 = arith.constant 0 : index
    %0 = vector.load %arg1[%c0, %c0_0] : memref<4x512xf32, #tpu.memory_space<vmem>>, vector<4x512xf32>
    %1 = arith.mulf %0, %0 : vector<4x512xf32>
    %c0_1 = arith.constant 0 : index
    %c0_2 = arith.constant 0 : index
    %2 = vector.load %arg2[%c0_1, %c0_2] : memref<512x128xf32, #tpu.memory_space<vmem>>, vector<512x128xf32>
    %cst = arith.constant dense<0.000000e+00> : vector<4x128xf32>
    %3 = tpu.matmul %1, %2, %cst {dimension_numbers = #tpu.dot_dimension_numbers<[1], [0], [0], [1], [0, 0, 1, 1], [], []>} : vector<4x512xf32>, vector<512x128xf32>, vector<4x128xf32> -> vector<4x128xf32>
    %cst_3 = arith.constant 2.500000e-01 : f32
    %4 = vector.broadcast %cst_3 : f32 to vector<4x128xf32>
    %5 = arith.mulf %3, %4 : vector<4x128xf32>
    %cst_4 = arith.constant 9.99999997E-7 : f32
    %6 = vector.broadcast %cst_4 : f32 to vector<4x128xf32>
    %7 = arith.addf %5, %6 : vector<4x128xf32>
    %8 = math.sqrt %7 : vector<4x128xf32>
    %c0_5 = arith.constant 0 : index
    %c0_6 = arith.constant 0 : index
    %9 = vector.load %arg3[%c0_5, %c0_6] : memref<4x128xf32, #tpu.memory_space<vmem>>, vector<4x128xf32>
    tpu.vector_store %arg3[%c0_5, %c0_6], %8 {strides = array<i32>} : memref<4x128xf32, #tpu.memory_space<vmem>>, vector<4x128xf32>,
    return
  }
  func.func @transform_0(%arg0: i32) -> (i32, i32) {
    %c0_i32 = arith.constant 0 : i32
    %c0_i32_0 = arith.constant 0 : i32
    return %arg0, %c0_i32 : i32, i32
  }
  func.func @transform_1(%arg0: i32) -> (i32, i32) {
    %c0_i32 = arith.constant 0 : i32
    %c0_i32_0 = arith.constant 0 : i32
    %c0_i32_1 = arith.constant 0 : i32
    return %c0_i32, %c0_i32_0 : i32, i32
  }
  func.func @transform_2(%arg0: i32) -> (i32, i32) {
    %c0_i32 = arith.constant 0 : i32
    %c0_i32_0 = arith.constant 0 : i32
    return %arg0, %c0_i32 : i32, i32
  }
}

</mosaic_0001>

<bundles_post_ra>
// kernel: tpu_custom_call.1
= control target key start
LH: loop header
LB: loop body
LE: loop exit
PB: predicated region body
PF: predicated region fallthrough
CT: control target
= control target key end

     0   :  { %7 = vsyncpa [#allocation3], 0  ;;  %s450_s0 = inlined_call_operand.hbm [shape: f32[4,512], index: 0, kind: input, shape index: {}]   ;;  %s451_s1 = inlined_call_operand.hbm [shape: f32[512,128], index: 1, kind: input, shape index: {}]   ;;  %s452_s2 = inlined_call_operand.hbm [shape: f32[4,128], index: 2, kind: output, shape index: {}]  }
   0x1   :  { %8 = vsyncpa [#allocation6], 0 }
   0x2   :  { %9 = vsyncpa [#allocation4], 0  ;;  %s421_s9 = smov [#allocation2]   ;;  %s422_s11 = smov [#allocation5]  }
   0x3   :  { %s16_s10 = sshll.u32 %s421_s9, 4  ;;  %s25_s12 = sshll.u32 %s422_s11, 4  ;;  %s17_s10 = int_to_ptr.vmem [resolvable:$true] %s16_s10  ;;  %s26_s12 = int_to_ptr.vmem [resolvable:$true] %s25_s12 }
   0x4   :  { %s363_s13 = scalar_lea.vmem %s17_s10, 256  ;;  %p368_p1 = scmp.lt.s32.totalorder %s17_s10, %s17_s10 }
   0x5   :  { %p364_p0 = scmp.ne.s32.totalorder %s17_s10, %s363_s13  ;;  %p369_p2 = scmp.lt.s32.totalorder %s363_s13, %s363_s13 }
   0x7   :  { %p370_p3 = por %p369_p2, %p368_p1 }
   0x9   :  { %p371_p4 = pnand %p370_p3, %p364_p0 }
   0xb   :  { %374 = shalt.err (!%p371_p4)
}
   0xc   :  { %19 = dma.hbm_to_vmem [thread:$0]  %s450_s0, 256, %s17_s10, [#allocation3]  }
   0xd   :  { %s383_s16 = scalar_lea.vmem %s26_s12, 8192  ;;  %p388_p6 = scmp.lt.s32.totalorder %s26_s12, %s26_s12 }
   0xe   :  { %p384_p5 = scmp.ne.s32.totalorder %s26_s12, %s383_s16  ;;  %p389_p7 = scmp.lt.s32.totalorder %s383_s16, %s383_s16 }
  0x10   :  { %p390_p8 = por %p389_p7, %p388_p6 }
  0x12   :  { %p391_p9 = pnand %p390_p8, %p384_p5 }
  0x14   :  { %394 = shalt.err (!%p391_p9)
}
  0x15   :  { %s423_s17 = smov 128   ;;  %s424_s18 = smov 8  }
  0x16   :  { %31 = dma.hbm_to_vmem [thread:$0]  %s451_s1, 8192, %s26_s12, [#allocation6], %s423_s17, %s423_s17, %s424_s18  }
  0x17   :  { %415 = dma.done.wait [#allocation3], 256  }
  0x18   :  { %416 = vsyncadd [#allocation3], 4294967040 }
  0x19   :  { %417 = dma.done.wait [#allocation6], 8192  }
  0x1a   :  { %418 = vsyncadd [#allocation6], 4294959104  ;;  %v73_v0 = vld [vmem:[#allocation5 + $0xf8] sm:$0xff]  ;;  %v72_v4 = vld [vmem:[#allocation5 + $0xf0] sm:$0xff]  ;;  %s425_s0 = smov [#allocation7]  }
  0x1b   :  { %v105_v1 = vld [vmem:[#allocation5 + $0x1f8] sm:$0xff]  ;;  %278 = vmatprep.subr.mxu0 %v73_v0  ;;  %v104_v5 = vld [vmem:[#allocation5 + $0x1f0] sm:$0xff]  ;;  %v71_v8 = vld [vmem:[#allocation5 + $0xe8] sm:$0xff]  ;;  %s268_s1 = sshll.u32 %s425_s0, 4  ;;  %s269_s1 = int_to_ptr.vmem [resolvable:$true] %s268_s1 }
  0x1c   :  { %v57_v2 = vld [vmem:[#allocation5 + $0x78] sm:$0xff]  ;;  %313 = vmatprep.subr.mxu1 %v105_v1  ;;  %v56_v6 = vld [vmem:[#allocation5 + $0x70] sm:$0xff]  ;;  %v103_v9 = vld [vmem:[#allocation5 + $0x1e8] sm:$0xff]  ;;  %s395_s21 = scalar_lea.vmem %s269_s1, 64  ;;  %p400_p11 = scmp.lt.s32.totalorder %s269_s1, %s269_s1 }
  0x1d   :  { %v89_v3 = vld [vmem:[#allocation5 + $0x178] sm:$0xff]  ;;  %279 = vmatpush3.msra.mxu0 %v57_v2  ;;  %v88_v7 = vld [vmem:[#allocation5 + $0x170] sm:$0xff]  ;;  %v55_v10 = vld [vmem:[#allocation5 + $0x68] sm:$0xff]  ;;  %p396_p10 = scmp.ne.s32.totalorder %s269_s1, %s395_s21  ;;  %p401_p12 = scmp.lt.s32.totalorder %s395_s21, %s395_s21 }
  0x1e   :  { %314 = vmatpush3.msra.mxu1 %v89_v3  ;;  %280 = vmatprep.subr.mxu0 %v72_v4  ;;  %v87_v11 = vld [vmem:[#allocation5 + $0x168] sm:$0xff]  ;;  %v70_v12 = vld [vmem:[#allocation5 + $0xe0] sm:$0xff]  ;;  %v69_v16 = vld [vmem:[#allocation5 + $0xd8] sm:$0xff] }
  0x1f   :  { %315 = vmatprep.subr.mxu1 %v104_v5  ;;  %281 = vmatpush3.msra.mxu0 %v56_v6  ;;  %v102_v13 = vld [vmem:[#allocation5 + $0x1e0] sm:$0xff]  ;;  %v101_v17 = vld [vmem:[#allocation5 + $0x1d8] sm:$0xff]  ;;  %v68_v20 = vld [vmem:[#allocation5 + $0xd0] sm:$0xff]  ;;  %p402_p13 = por %p401_p12, %p400_p11 }
  0x20   :  { %316 = vmatpush3.msra.mxu1 %v88_v7  ;;  %282 = vmatprep.subr.mxu0 %v71_v8  ;;  %v54_v14 = vld [vmem:[#allocation5 + $0x60] sm:$0xff]  ;;  %v53_v18 = vld [vmem:[#allocation5 + $0x58] sm:$0xff]  ;;  %v100_v21 = vld [vmem:[#allocation5 + $0x1d0] sm:$0xff] }
  0x21   :  { %317 = vmatprep.subr.mxu1 %v103_v9  ;;  %v86_v15 = vld [vmem:[#allocation5 + $0x160] sm:$0xff]  ;;  %283 = vmatpush3.msra.mxu0 %v55_v10  ;;  %v85_v19 = vld [vmem:[#allocation5 + $0x158] sm:$0xff]  ;;  %v52_v22 = vld [vmem:[#allocation5 + $0x50] sm:$0xff]  ;;  %p403_p0 = pnand %p402_p13, %p396_p10 }
  0x22   :  { %318 = vmatpush3.msra.mxu1 %v87_v11  ;;  %284 = vmatprep.subr.mxu0 %v70_v12  ;;  %v84_v23 = vld [vmem:[#allocation5 + $0x150] sm:$0xff]  ;;  %v67_v24 = vld [vmem:[#allocation5 + $0xc8] sm:$0xff]  ;;  %v66_v28 = vld [vmem:[#allocation5 + $0xc0] sm:$0xff] }
  0x23   :  { %319 = vmatprep.subr.mxu1 %v102_v13  ;;  %285 = vmatpush3.msra.mxu0 %v54_v14  ;;  %v99_v25 = vld [vmem:[#allocation5 + $0x1c8] sm:$0xff]  ;;  %v98_v29 = vld [vmem:[#allocation5 + $0x1c0] sm:$0xff]  ;;  %v65_v32 = vld [vmem:[#allocation5 + $0xb8] sm:$0xff] }
  0x24   :  { %320 = vmatpush3.msra.mxu1 %v86_v15  ;;  %286 = vmatprep.subr.mxu0 %v69_v16  ;;  %v51_v26 = vld [vmem:[#allocation5 + $0x48] sm:$0xff]  ;;  %v50_v30 = vld [vmem:[#allocation5 + $0x40] sm:$0xff]  ;;  %v97_v33 = vld [vmem:[#allocation5 + $0x1b8] sm:$0xff] }
  0x25   :  { %321 = vmatprep.subr.mxu1 %v101_v17  ;;  %287 = vmatpush3.msra.mxu0 %v53_v18  ;;  %v83_v27 = vld [vmem:[#allocation5 + $0x148] sm:$0xff]  ;;  %v82_v31 = vld [vmem:[#allocation5 + $0x140] sm:$0xff]  ;;  %v49_v34 = vld [vmem:[#allocation5 + $0x38] sm:$0xff] }
  0x26   :  { %322 = vmatpush3.msra.mxu1 %v85_v19  ;;  %288 = vmatprep.subr.mxu0 %v68_v20  ;;  %v81_v35 = vld [vmem:[#allocation5 + $0x138] sm:$0xff]  ;;  %v64_v36 = vld [vmem:[#allocation5 + $0xb0] sm:$0xff]  ;;  %v63_v40 = vld [vmem:[#allocation5 + $0xa8] sm:$0xff] }
  0x27   :  { %323 = vmatprep.subr.mxu1 %v100_v21  ;;  %289 = vmatpush3.msra.mxu0 %v52_v22  ;;  %v96_v37 = vld [vmem:[#allocation5 + $0x1b0] sm:$0xff]  ;;  %v95_v41 = vld [vmem:[#allocation5 + $0x1a8] sm:$0xff]  ;;  %v62_v44 = vld [vmem:[#allocation5 + $0xa0] sm:$0xff] }
  0x28   :  { %324 = vmatpush3.msra.mxu1 %v84_v23  ;;  %290 = vmatprep.subr.mxu0 %v67_v24  ;;  %v48_v38 = vld [vmem:[#allocation5 + $0x30] sm:$0xff]  ;;  %v47_v42 = vld [vmem:[#allocation5 + $0x28] sm:$0xff]  ;;  %v94_v45 = vld [vmem:[#allocation5 + $0x1a0] sm:$0xff] }
  0x29   :  { %325 = vmatprep.subr.mxu1 %v99_v25  ;;  %291 = vmatpush3.msra.mxu0 %v51_v26  ;;  %v80_v39 = vld [vmem:[#allocation5 + $0x130] sm:$0xff]  ;;  %v79_v43 = vld [vmem:[#allocation5 + $0x128] sm:$0xff]  ;;  %v46_v46 = vld [vmem:[#allocation5 + $0x20] sm:$0xff] }
  0x2a   :  { %326 = vmatpush3.msra.mxu1 %v83_v27  ;;  %292 = vmatprep.subr.mxu0 %v66_v28  ;;  %v78_v47 = vld [vmem:[#allocation5 + $0x120] sm:$0xff]  ;;  %v38_v48 = vld [vmem:[#allocation2] sm:$0xff]  ;;  %v61_v49 = vld [vmem:[#allocation5 + $0x98] sm:$0xff] }
  0x2b   :  { %327 = vmatprep.subr.mxu1 %v98_v29  ;;  %293 = vmatpush3.msra.mxu0 %v50_v30  ;;  %v93_v50 = vld [vmem:[#allocation5 + $0x198] sm:$0xff]  ;;  %v60_v54 = vld [vmem:[#allocation5 + $0x90] sm:$0xff]  ;;  %v40_v56 = vmul.f32 %v38_v48, %v38_v48  ;;  %v59_v60 = vld [vmem:[#allocation5 + $0x88] sm:$0xff] }
  0x2c   :  { %328 = vmatpush3.msra.mxu1 %v82_v31  ;;  %294 = vmatprep.subr.mxu0 %v65_v32  ;;  %v39_v51 = vld [vmem:[#allocation2 + $0x8] sm:$0xff]  ;;  %v92_v55 = vld [vmem:[#allocation5 + $0x190] sm:$0xff]  ;;  %v91_v61 = vld [vmem:[#allocation5 + $0x188] sm:$0xff] }
  0x2d   :  { %329 = vmatprep.subr.mxu1 %v97_v33  ;;  %295 = vmatpush3.msra.mxu0 %v49_v34  ;;  %v45_v52 = vld [vmem:[#allocation5 + $0x18] sm:$0xff]  ;;  %v44_v57 = vld [vmem:[#allocation5 + $0x10] sm:$0xff]  ;;  %v41_v59 = vmul.f32 %v39_v51, %v39_v51  ;;  %v43_v62 = vld [vmem:[#allocation5 + $0x8] sm:$0xff]  ;;  %v108_v2 = vcombine.high %v40_v56, %v40_v56 }
  0x2e   :  { %330 = vmatpush3.msra.mxu1 %v81_v35  ;;  %296 = vmatprep.subr.mxu0 %v64_v36  ;;  %v77_v53 = vld [vmem:[#allocation5 + $0x118] sm:$0xff]  ;;  %v76_v58 = vld [vmem:[#allocation5 + $0x110] sm:$0xff]  ;;  %v75_v63 = vld [vmem:[#allocation5 + $0x108] sm:$0xff] }
  0x2f   :  { %331 = vmatprep.subr.mxu1 %v96_v37  ;;  %297 = vmatpush3.msra.mxu0 %v48_v38  ;;  %v58_v0 = vld [vmem:[#allocation5 + $0x80] sm:$0xff]  ;;  %v109_v4 = vcombine.high %v41_v59, %v41_v59 }
  0x30   :  { %332 = vmatpush3.msra.mxu1 %v80_v39  ;;  %298 = vmatprep.subr.mxu0 %v63_v40  ;;  %v90_v1 = vld [vmem:[#allocation5 + $0x180] sm:$0xff] }
  0x31   :  { %333 = vmatprep.subr.mxu1 %v95_v41  ;;  %299 = vmatpush3.msra.mxu0 %v47_v42  ;;  %v42_v3 = vld [vmem:[#allocation5] sm:$0xff] }
  0x32   :  { %334 = vmatpush3.msra.mxu1 %v79_v43  ;;  %300 = vmatprep.subr.mxu0 %v62_v44  ;;  %v74_v5 = vld [vmem:[#allocation5 + $0x100] sm:$0xff] }
  0x33   :  { %335 = vmatprep.subr.mxu1 %v94_v45  ;;  %301 = vmatpush3.msra.mxu0 %v46_v46 }
  0x34   :  { %336 = vmatpush3.msra.mxu1 %v78_v47  ;;  %302 = vmatprep.subr.mxu0 %v61_v49 }
  0x35   :  { %337 = vmatprep.subr.mxu1 %v93_v50  ;;  %303 = vmatpush3.msra.mxu0 %v45_v52 }
  0x36   :  { %338 = vmatpush3.msra.mxu1 %v77_v53  ;;  %304 = vmatprep.subr.mxu0 %v60_v54 }
  0x37   :  { %339 = vmatprep.subr.mxu1 %v92_v55  ;;  %305 = vmatpush3.msra.mxu0 %v44_v57 }
  0x38   :  { %340 = vmatpush3.msra.mxu1 %v76_v58  ;;  %306 = vmatprep.subr.mxu0 %v59_v60 }
  0x39   :  { %341 = vmatprep.subr.mxu1 %v91_v61  ;;  %307 = vmatpush3.msra.mxu0 %v43_v62 }
  0x3a   :  { %342 = vmatpush3.msra.mxu1 %v75_v63  ;;  %308 = vmatprep.subr.mxu0 %v58_v0 }
  0x3b   :  { %343 = vmatprep.subr.mxu1 %v90_v1  ;;  %309 = vmatpush3.msra.mxu0 %v42_v3 }
  0x3c   :  { %176 = vmatprep.mubr.f32.mxu0 %v108_v2  ;;  %344 = vmatpush3.msra.mxu1 %v74_v5 }
  0x3d   :  { %246 = vmatprep.mubr.f32.mxu1 %v109_v4  ;;  %177 = vmatmul.mubr.f32.vlgmr.msra.gmra.mxu0 %v40_v56 }
  0x3e   :  { %247 = vmatmul.mubr.f32.vlgmr.msra.gmra.mxu1 %v41_v59 }
  0xfd   :  { %v310_v6 = vpop.f32.mrf.mxu0 }
  0xfe   :  { %v345_v7 = vpop.f32.mrf.mxu1 }
  0xff   :  { %v311_v8 = vpop.f32.mrf.mxu0 }
 0x100   :  { %v346_v9 = vpop.f32.mrf.mxu1  ;;  %v312_v10 = vadd.f32 %v311_v8, %v310_v6 }
 0x101   :  { %v347_v11 = vadd.f32 %v346_v9, %v345_v7 }
 0x103   :  { %v249_v12 = vadd.f32 %v347_v11, %v312_v10 }
 0x105   :  { %v252_v13 = vmul.f32 0.25, %v249_v12 }
 0x107   :  { %v253_v14 = vadd.f32 1e-06, %v252_v13 }
 0x109   :  { %353 = vrsqrt.f32 %v253_v14  ;;  %vm256_vm0 = vcmp.eq.f32.partialorder %v253_v14, inf  ;;  %v259_v17 = vand.u32 2147483648, %v253_v14  ;;  %vm258_vm1 = vcmp.eq.f32.partialorder %v253_v14, 0.0 }
 0x116   :  { %v354_v15 = vpop.eup %353 }
 0x117   :  { %v255_v16 = vmul.f32 %v354_v15, %v253_v14 }
 0x119   :  { %v257_v18 = vsel %vm256_vm0, %v253_v14, %v255_v16 }
 0x11a   :  { %v260_v19 = vsel %vm258_vm1, %v259_v17, %v257_v18 }
 0x11b   :  { %261 = vst [vmem:[#allocation7] sm:$0xf] %v260_v19 }
 0x11c   :  { %406 = shalt.err (!%p403_p0)
}
 0x11d   :  { %271 = dma.vmem_to_hbm [thread:$0]  %s269_s1, 64, %s452_s2, [#allocation4]  }
 0x11e   :  { %419 = dma.done.wait [#allocation4], 64  }
 0x11f   :  { %420 = vsyncadd [#allocation4], 4294967232 }
 0x120   :  { %275 = vsyncpa [#allocation3], 1 }
 0x121   :  { %276 = vsyncpa [#allocation6], 1 }
 0x122   :  { %277 = vsyncpa [#allocation4], 1 }

</bundles_post_ra>
